<compile_context>
chip_gen: v7x
topology: tpu7x:2x2x1
jax: 0.10.0
libtpu: 0.0.40
codegen_flags: <defaults>
</compile_context>

<pallas_src>
import functools

import jax
import jax.numpy as jnp
from jax import lax
from jax.experimental import pallas as pl
from jax.experimental.pallas import tpu as pltpu

EPS = 1e-6
_INV_SQRT2 = 0.7071067811865476
_LANE = 128


def _rup(n, m=_LANE):
    return ((n + m - 1) // m) * m


# ----------------------------------------------------------------------------
# Generation-aware tuning knobs (v5e/v6e: 128 MiB VMEM; v7x: 64 MiB).
# ----------------------------------------------------------------------------
def _vmem_capacity_bytes():
    try:
        return int(pltpu.get_tpu_info().vmem_capacity_bytes)
    except Exception:
        return 64 * 1024 * 1024          # conservative (v7x-sized) fallback


def _device_kind():
    try:
        return jax.devices()[0].device_kind.lower()
    except Exception:
        return ""


_VMEM_CAP = _vmem_capacity_bytes()
# v5e/v6e (128 MiB): 96 MiB scoped limit, 512-row tiles.  v7x (64 MiB): 48 MiB, 256.
_VMEM_LIMIT = min(96 * 1024 * 1024, (_VMEM_CAP * 3) // 4)
_ROW_TARGET = 512 if _VMEM_CAP >= 100 * 1024 * 1024 else 256
# bf16 elementwise maths only where the VPU is bf16-capable (v6e/v7x); v5e stays f32.
_BF16_EW = any(t in _device_kind() for t in ("v6", "v7"))


def _row_tile(m):
    # Multiple of 16 (native bf16 sublane tile) so bf16 row blocks are clean.
    return min(_ROW_TARGET, _rup(m, 16))


def _pad_rows(x2d, tm):
    m = x2d.shape[0]
    mp = ((m + tm - 1) // tm) * tm
    if mp != m:
        x2d = jnp.pad(x2d, ((0, mp - m), (0, 0)))
    return x2d, mp


def _row_params():
    return pltpu.CompilerParams(dimension_semantics=("parallel",),
                                vmem_limit_bytes=_VMEM_LIMIT)


# ----------------------------------------------------------------------------
# In-kernel helpers
# ----------------------------------------------------------------------------
def _masked_layernorm(x, g, b, c_actual, mask=None):
    """LayerNorm over the last (lane-padded) dim using only the first
    `c_actual` channels for the statistics (matches F.layer_norm and the
    channels_first LayerNorm of the PyTorch module: biased var, eps in sqrt).
    Padded lanes of the output are 0 because g/b are zero-padded."""
    cp = x.shape[-1]
    inv_c = 1.0 / c_actual
    if c_actual == cp:
        mu = jnp.mean(x, axis=-1, keepdims=True)
        d = x - mu
    else:
        if mask is None:
            mask = lax.broadcasted_iota(jnp.int32, x.shape, x.ndim - 1) < c_actual
        xm = jnp.where(mask, x, 0.0)
        mu = jnp.sum(xm, axis=-1, keepdims=True) * inv_c
        d = jnp.where(mask, x - mu, 0.0)
    var = jnp.sum(d * d, axis=-1, keepdims=True) * inv_c
    return d * lax.rsqrt(var + EPS) * g + b


# ----------------------------------------------------------------------------
# Pallas kernels
# ----------------------------------------------------------------------------
def _stem_conv_ln_kernel(x_ref, w_ref, b_ref, g_ref, bb_ref, o_ref, *, C):
    # Stem: 4x4/s4 conv as matmul on (K-padded, lane-dense) space-to-depth
    # patches, fused with the channels_first LayerNorm.
    y = jnp.dot(x_ref[...].astype(jnp.bfloat16), w_ref[...],
                preferred_element_type=jnp.float32) + b_ref[...]
    o_ref[...] = _masked_layernorm(y, g_ref[...], bb_ref[...], C)


def _ds_ln_conv_kernel(x_ref, w_ref, b_ref, g_ref, bb_ref, o_ref, *, C_in):
    # Downsample: channels_first LayerNorm on the input, then 2x2/s2 conv.
    # x_ref: (TM, 4*Cp_in) space-to-depth patches (patch order kh,kw then C).
    # The lane mask is built once (hoisted) and the 4 normalized slabs are
    # concatenated for a single long-K MXU contraction.
    cp_in = g_ref.shape[-1]
    x = x_ref[...]
    g = g_ref[...]
    bb = bb_ref[...]
    tm = x.shape[0]
    mask = None
    if C_in != cp_in:
        mask = lax.broadcasted_iota(jnp.int32, (tm, cp_in), 1) < C_in
    slabs = []
    for p in range(4):
        slab = x[:, p * cp_in:(p + 1) * cp_in]
        slabs.append(_masked_layernorm(slab, g, bb, C_in, mask)
                     .astype(jnp.bfloat16))
    xn = jnp.concatenate(slabs, axis=-1)                 # (TM, 4*Cp_in) bf16
    o_ref[...] = jnp.dot(xn, w_ref[...],
                         preferred_element_type=jnp.float32) + b_ref[...]


def _dwconv7_kernel(x_ref, w_ref, b_ref, o_ref, xpad_ref, *, HT):
    # Depthwise 7x7, padding 3.  x_ref: (H, W, Cp) f32 (one image, batch
    # squeezed); o_ref: (H, W, Cp) bf16.  The halo is built in VMEM: only the
    # 3-wide border strips are zeroed, the interior is written once.  Output
    # rows are produced HT at a time so the 49-tap accumulator stays small.
    # TODO(synk): replace the kw window slices with pltpu.roll (XLU) once
    # sublane-rotate lowering for this shape is validated on all generations.
    # TODO(synk): at large resolutions, also tile H at the grid level so the
    # padded scratch stays bounded on v7x's 64 MiB VMEM.
    H, W, Cp = x_ref.shape
    WP = xpad_ref.shape[1]                                # W + 6

    xpad_ref[0:3, :, :] = jnp.zeros((3, WP, Cp), jnp.float32)
    xpad_ref[H + 3:H + 6, :, :] = jnp.zeros((3, WP, Cp), jnp.float32)
    xpad_ref[3:H + 3, 0:3, :] = jnp.zeros((H, 3, Cp), jnp.float32)
    xpad_ref[3:H + 3, W + 3:WP, :] = jnp.zeros((H, 3, Cp), jnp.float32)
    xpad_ref[3:H + 3, 3:W + 3, :] = x_ref[...]

    w = w_ref[...]                                        # (49, Cp)
    bias = b_ref[0, :]                                    # (Cp,)
    n_tiles = H // HT

    def tile_body(t, carry):
        h0 = t * HT
        acc = jnp.zeros((HT, W, Cp), jnp.float32)
        for kh in range(7):
            strip = xpad_ref[pl.ds(h0 + kh, HT), :, :]    # (HT, WP, Cp)
            for kw in range(7):
                acc = acc + strip[:, kw:kw + W, :] * w[kh * 7 + kw]
        o_ref[pl.ds(h0, HT), :, :] = (acc + bias).astype(o_ref.dtype)
        return carry

    lax.fori_loop(0, n_tiles, tile_body, 0, unroll=True)


def _block_tail_kernel(res_ref, x_ref, lng_ref, lnb_ref, w1_ref, b1_ref,
                       w2_ref, b2_ref, gamma_ref, o_ref, *, C, bf16_ew):
    # Fused ConvNeXt-block tail: LayerNorm -> Linear(C,4C) -> exact GELU
    # -> Linear(4C,C) -> layer-scale gamma -> residual add.
    # Row-tiled over M = N*H*W; matmul operands bf16, accumulation f32.
    # TODO(synk): for production dims on v7x (64 MiB VMEM) add an Hp
    # ("arbitrary") grid axis / K-tiling of w2, and pin invariant weight
    # blocks to a single buffer (pipeline_mode=pl.Buffered(1)).
    x = x_ref[...].astype(jnp.float32)
    xn = _masked_layernorm(x, lng_ref[...], lnb_ref[...], C)
    h = jnp.dot(xn.astype(jnp.bfloat16), w1_ref[...],
                preferred_element_type=jnp.float32) + b1_ref[...]
    t = lax.erf(h * _INV_SQRT2)            # exact GELU; erf stays f32 (EUP)
    if bf16_ew:
        # TODO(synk): move erf itself to bf16 once bf16-erf lowering is verified.
        hb = h.astype(jnp.bfloat16)
        gl = (0.5 * hb) * (1.0 + t.astype(jnp.bfloat16))
    else:
        gl = (0.5 * h * (1.0 + t)).astype(jnp.bfloat16)
    y = jnp.dot(gl, w2_ref[...], preferred_element_type=jnp.float32) + b2_ref[...]
    o_ref[...] = res_ref[...] + y * gamma_ref[...]


def _head_kernel(x_ref, g_ref, b_ref, w_ref, hb_ref, o_ref, *, C, HW):
    # Fused head: global mean pool over spatial -> LayerNorm -> Linear.
    pooled = jnp.sum(x_ref[...], axis=1) * (1.0 / HW)     # (TB, Cp)
    xn = _masked_layernorm(pooled, g_ref[...], b_ref[...], C)
    o_ref[...] = jnp.dot(xn.astype(jnp.bfloat16), w_ref[...],
                         preferred_element_type=jnp.float32) + hb_ref[...]


# ----------------------------------------------------------------------------
# Kernel wrappers
# ----------------------------------------------------------------------------
def stem_conv_ln(patches, p, C):
    M, K = patches.shape
    Cp = p["conv_w"].shape[1]
    TM = _row_tile(M)
    patches, Mp = _pad_rows(patches, TM)
    out = pl.pallas_call(
        functools.partial(_stem_conv_ln_kernel, C=C),
        out_shape=jax.ShapeDtypeStruct((Mp, Cp), jnp.float32),
        grid=(Mp // TM,),
        in_specs=[
            pl.BlockSpec((TM, K), lambda i: (i, 0)),
            pl.BlockSpec((K, Cp), lambda i: (0, 0)),
            pl.BlockSpec((1, Cp), lambda i: (0, 0)),
            pl.BlockSpec((1, Cp), lambda i: (0, 0)),
            pl.BlockSpec((1, Cp), lambda i: (0, 0)),
        ],
        out_specs=pl.BlockSpec((TM, Cp), lambda i: (i, 0)),
        compiler_params=_row_params(),
    )(patches, p["conv_w"], p["conv_b"], p["ln_g"], p["ln_b"])
    return out[:M] if Mp != M else out


def downsample_ln_conv(patches, p, C_in):
    M, K4 = patches.shape
    Cp_out = p["conv_w"].shape[1]
    Cp_in = p["ln_g"].shape[1]
    TM = _row_tile(M)
    patches, Mp = _pad_rows(patches, TM)
    out = pl.pallas_call(
        functools.partial(_ds_ln_conv_kernel, C_in=C_in),
        out_shape=jax.ShapeDtypeStruct((Mp, Cp_out), jnp.float32),
        grid=(Mp // TM,),
        in_specs=[
            pl.BlockSpec((TM, K4), lambda i: (i, 0)),
            pl.BlockSpec((K4, Cp_out), lambda i: (0, 0)),
            pl.BlockSpec((1, Cp_out), lambda i: (0, 0)),
            pl.BlockSpec((1, Cp_in), lambda i: (0, 0)),
            pl.BlockSpec((1, Cp_in), lambda i: (0, 0)),
        ],
        out_specs=pl.BlockSpec((TM, Cp_out), lambda i: (i, 0)),
        compiler_params=_row_params(),
    )(patches, p["conv_w"], p["conv_b"], p["ln_g"], p["ln_b"])
    return out[:M] if Mp != M else out


def dwconv7(x_nhwc, w49c, b):
    N, H, W, Cp = x_nhwc.shape
    HT = 8 if H % 8 == 0 else H          # small late-stage maps take whole H
    return pl.pallas_call(
        functools.partial(_dwconv7_kernel, HT=HT),
        out_shape=jax.ShapeDtypeStruct((N, H, W, Cp), jnp.bfloat16),
        grid=(N,),
        in_specs=[
            pl.BlockSpec((None, H, W, Cp), lambda n: (n, 0, 0, 0)),
            pl.BlockSpec((49, Cp), lambda n: (0, 0)),
            pl.BlockSpec((1, Cp), lambda n: (0, 0)),
        ],
        out_specs=pl.BlockSpec((None, H, W, Cp), lambda n: (n, 0, 0, 0)),
        scratch_shapes=[pltpu.VMEM((H + 6, W + 6, Cp), jnp.float32)],
        compiler_params=_row_params(),
    )(x_nhwc, w49c, b)


def block_tail(res2d, y2d, p, C):
    M, Cp = res2d.shape
    Hp = p["w1"].shape[1]
    TM = _row_tile(M)
    res2d, Mp = _pad_rows(res2d, TM)
    y2d, _ = _pad_rows(y2d, TM)
    out = pl.pallas_call(
        functools.partial(_block_tail_kernel, C=C, bf16_ew=_BF16_EW),
        out_shape=jax.ShapeDtypeStruct((Mp, Cp), jnp.float32),
        grid=(Mp // TM,),
        in_specs=[
            pl.BlockSpec((TM, Cp), lambda i: (i, 0)),   # residual (f32)
            pl.BlockSpec((TM, Cp), lambda i: (i, 0)),   # dwconv output (bf16)
            pl.BlockSpec((1, Cp), lambda i: (0, 0)),    # ln gamma
            pl.BlockSpec((1, Cp), lambda i: (0, 0)),    # ln beta
            pl.BlockSpec((Cp, Hp), lambda i: (0, 0)),   # w1 (bf16)
            pl.BlockSpec((1, Hp), lambda i: (0, 0)),    # b1
            pl.BlockSpec((Hp, Cp), lambda i: (0, 0)),   # w2 (bf16)
            pl.BlockSpec((1, Cp), lambda i: (0, 0)),    # b2
            pl.BlockSpec((1, Cp), lambda i: (0, 0)),    # layer-scale gamma
        ],
        out_specs=pl.BlockSpec((TM, Cp), lambda i: (i, 0)),
        compiler_params=_row_params(),
    )(res2d, y2d, p["ln_g"], p["ln_b"], p["w1"], p["b1"],
      p["w2"], p["b2"], p["gamma"])
    return out[:M] if Mp != M else out


def head_pool_ln_fc(x3d, norm_g, norm_b, head_w, head_b, C):
    N, HW, Cp = x3d.shape
    NCp = head_w.shape[1]
    TB = min(8, N)
    Np = ((N + TB - 1) // TB) * TB
    if Np != N:
        x3d = jnp.pad(x3d, ((0, Np - N), (0, 0), (0, 0)))
    out = pl.pallas_call(
        functools.partial(_head_kernel, C=C, HW=HW),
        out_shape=jax.ShapeDtypeStruct((Np, NCp), jnp.float32),
        grid=(Np // TB,),
        in_specs=[
            pl.BlockSpec((TB, HW, Cp), lambda i: (i, 0, 0)),
            pl.BlockSpec((1, Cp), lambda i: (0, 0)),
            pl.BlockSpec((1, Cp), lambda i: (0, 0)),
            pl.BlockSpec((Cp, NCp), lambda i: (0, 0)),
            pl.BlockSpec((1, NCp), lambda i: (0, 0)),
        ],
        out_specs=pl.BlockSpec((TB, NCp), lambda i: (i, 0)),
        compiler_params=_row_params(),
    )(x3d, norm_g, norm_b, head_w, head_b)
    return out[:N] if Np != N else out


# ----------------------------------------------------------------------------
# Plain-JAX glue
# ----------------------------------------------------------------------------
def space_to_depth(x, k):
    # NHWC -> (N, H/k, W/k, k*k*C), patch order (kh, kw, c)
    # TODO(synk): fuse this HBM transpose into the stem/downsample kernels
    # (in-kernel stride-k gather) to save one activation read+write per stage.
    N, H, W, C = x.shape
    x = x.reshape(N, H // k, k, W // k, k, C)
    x = x.transpose(0, 1, 3, 2, 4, 5)
    return x.reshape(N, H // k, W // k, k * k * C)


def block_forward(x, p, C):
    # ConvNeXt Block: dwconv (bf16 out) -> fused LN/MLP/GELU/gamma -> residual.
    # drop_path rate = 0.0 -> identity (matches the PyTorch default here).
    N, H, W, Cp = x.shape
    y = dwconv7(x, p["dw_w"], p["dw_b"])
    out = block_tail(x.reshape(N * H * W, Cp), y.reshape(N * H * W, Cp), p, C)
    return out.reshape(N, H, W, Cp)


def convnext_forward(params, x_nchw):
    x = jnp.transpose(x_nchw, (0, 2, 3, 1)).astype(jnp.float32)  # NCHW -> NHWC
    dims = params["dims"]
    dp = [_rup(d) for d in dims]

    for i in range(4):
        ds = params["downsample"][i]
        if i == 0:
            # stem: Conv2d(k=4, s=4) fused with channels_first LayerNorm.
            p = space_to_depth(x, 4)
            N, Ho, Wo, K = p.shape
            Kp = ds["conv_w"].shape[0]
            p2 = p.reshape(N * Ho * Wo, K)
            if Kp != K:                                 # lane-dense K for MXU
                p2 = jnp.pad(p2, ((0, 0), (0, Kp - K)))
            y = stem_conv_ln(p2, ds, dims[0])
            x = y.reshape(N, Ho, Wo, dp[0])
        else:
            # channels_first LayerNorm fused into Conv2d(k=2, s=2)
            p = space_to_depth(x, 2)
            N, Ho, Wo, K4 = p.shape
            y = downsample_ln_conv(p.reshape(N * Ho * Wo, K4), ds, dims[i - 1])
            x = y.reshape(N, Ho, Wo, dp[i])
        for blk in params["stages"][i]:
            x = block_forward(x, blk, dims[i])

    # head: global mean pool over (H, W) -> LayerNorm -> Linear (fused)
    N, H, W, Cp = x.shape
    logits_p = head_pool_ln_fc(x.reshape(N, H * W, Cp), params["norm_g"],
                               params["norm_b"], params["head_w"],
                               params["head_b"], dims[-1])
    return logits_p[:, :params["num_classes"]]


# ----------------------------------------------------------------------------
# Deterministic parameter init (mirrors ConvNeXt.__init__: trunc_normal std=.02
# on conv/linear weights, zero biases, LN weight=1/bias=0, gamma=layer_scale,
# head weight AND bias scaled by head_init_scale).  Channel dims are
# zero-padded to 128-lane multiples; matmul weights are stored bf16
# (MXU-native), everything else f32.
# ----------------------------------------------------------------------------
def _pad(a, shape_p):
    pads = [(0, p - s) for s, p in zip(a.shape, shape_p)]
    return jnp.pad(a.astype(jnp.float32), pads)


def init_params(key, in_chans=3, num_classes=10, depths=(1, 1, 1, 1),
                dims=(8, 16, 32, 64), layer_scale_init_value=1e-6,
                head_init_scale=1.0):
    kiter = iter(jax.random.split(key, 512))

    def tn(shape, std=0.02):
        return jax.random.truncated_normal(next(kiter), -2.0, 2.0, shape,
                                           jnp.float32) * std

    dp = [_rup(d) for d in dims]
    hp = [_rup(4 * d) for d in dims]
    ncp = _rup(num_classes)
    k0 = 16 * in_chans
    k0p = _rup(k0)

    downsample = [dict(  # stem: contraction dim zero-padded to a lane multiple
        conv_w=_pad(tn((k0, dims[0])), (k0p, dp[0])).astype(jnp.bfloat16),
        conv_b=jnp.zeros((1, dp[0]), jnp.float32),
        ln_g=_pad(jnp.ones((1, dims[0]), jnp.float32), (1, dp[0])),
        ln_b=jnp.zeros((1, dp[0]), jnp.float32),
    )]
    for i in range(3):
        w4 = _pad(tn((4, dims[i], dims[i + 1])), (4, dp[i], dp[i + 1]))
        downsample.append(dict(
            ln_g=_pad(jnp.ones((1, dims[i]), jnp.float32), (1, dp[i])),
            ln_b=jnp.zeros((1, dp[i]), jnp.float32),
            conv_w=w4.reshape(4 * dp[i], dp[i + 1]).astype(jnp.bfloat16),
            conv_b=jnp.zeros((1, dp[i + 1]), jnp.float32),
        ))

    stages = []
    for i in range(4):
        d, dpi, hpi = dims[i], dp[i], hp[i]
        blocks = []
        for _ in range(depths[i]):
            blocks.append(dict(
                dw_w=_pad(tn((49, d)), (49, dpi)),          # depthwise 7x7 (kh*7+kw, C)
                dw_b=jnp.zeros((1, dpi), jnp.float32),
                ln_g=_pad(jnp.ones((1, d), jnp.float32), (1, dpi)),
                ln_b=jnp.zeros((1, dpi), jnp.float32),
                w1=_pad(tn((d, 4 * d)), (dpi, hpi)).astype(jnp.bfloat16),
                b1=jnp.zeros((1, hpi), jnp.float32),
                w2=_pad(tn((4 * d, d)), (hpi, dpi)).astype(jnp.bfloat16),
                b2=jnp.zeros((1, dpi), jnp.float32),
                gamma=_pad(jnp.full((1, d), layer_scale_init_value, jnp.float32),
                           (1, dpi)),
            ))
        stages.append(blocks)

    return dict(
        downsample=downsample,
        stages=stages,
        norm_g=_pad(jnp.ones((1, dims[-1]), jnp.float32), (1, dp[-1])),
        norm_b=jnp.zeros((1, dp[-1]), jnp.float32),
        head_w=(_pad(tn((dims[-1], num_classes)), (dp[-1], ncp))
                * head_init_scale).astype(jnp.bfloat16),
        head_b=jnp.zeros((1, ncp), jnp.float32) * head_init_scale,
        depths=tuple(depths),
        dims=tuple(dims),
        num_classes=num_classes,
    )


if __name__ == "__main__":
    key = jax.random.PRNGKey(0)
    pkey, xkey = jax.random.split(key)

    # small ConvNeXt: depths (1,1,1,1), dims (8,16,32,64), 10 classes
    params = init_params(pkey, in_chans=3, num_classes=10,
                         depths=(1, 1, 1, 1), dims=(8, 16, 32, 64))

    # NCHW input like PyTorch; 32x32 so all four downsamples are valid
    x = jax.random.normal(xkey, (2, 3, 32, 32), jnp.float32)

    logits = convnext_forward(params, x)
    jax.block_until_ready(logits)
    assert logits.shape == (2, 10) and logits.dtype == jnp.float32
    assert bool(jnp.all(jnp.isfinite(logits)))
    print("KERNEL_OK")
</pallas_src>

<mosaic_0001>
module attributes {stable_mosaic.version = 11 : i64} {
  func.func @_stem_conv_ln_kernel(%arg0: i32, %arg1: memref<128x128xf32, #tpu.memory_space<vmem>>, %arg2: memref<128x128xbf16, #tpu.memory_space<vmem>>, %arg3: memref<1x128xf32, #tpu.memory_space<vmem>>, %arg4: memref<1x128xf32, #tpu.memory_space<vmem>>, %arg5: memref<1x128xf32, #tpu.memory_space<vmem>>, %arg6: memref<128x128xf32, #tpu.memory_space<vmem>>) attributes {dimension_semantics = [#tpu.dimension_semantics<parallel>], iteration_bounds = array<i64: 1>, scalar_prefetch = 0 : i64, scratch_operands = 0 : i64, tpu.core_type = #tpu.core_type<tc>, window_params = [{transform_indices = @transform_0, window_bounds = array<i64: 128, 128>}, {pipeline_mode = #tpu.pipeline_mode<synchronous>, transform_indices = @transform_1, window_bounds = array<i64: 128, 128>}, {pipeline_mode = #tpu.pipeline_mode<synchronous>, transform_indices = @transform_2, window_bounds = array<i64: 1, 128>}, {pipeline_mode = #tpu.pipeline_mode<synchronous>, transform_indices = @transform_3, window_bounds = array<i64: 1, 128>}, {pipeline_mode = #tpu.pipeline_mode<synchronous>, transform_indices = @transform_4, window_bounds = array<i64: 1, 128>}, {transform_indices = @transform_5, window_bounds = array<i64: 128, 128>}]} {
    %c0 = arith.constant 0 : index
    %c0_0 = arith.constant 0 : index
    %0 = vector.load %arg1[%c0, %c0_0] : memref<128x128xf32, #tpu.memory_space<vmem>>, vector<128x128xf32>
    %1 = arith.truncf %0 : vector<128x128xf32> to vector<128x128xbf16>
    %c0_1 = arith.constant 0 : index
    %c0_2 = arith.constant 0 : index
    %2 = vector.load %arg2[%c0_1, %c0_2] : memref<128x128xbf16, #tpu.memory_space<vmem>>, vector<128x128xbf16>
    %cst = arith.constant dense<0.000000e+00> : vector<128x128xf32>
    %3 = tpu.matmul %1, %2, %cst {dimension_numbers = #tpu.dot_dimension_numbers<[1], [0], [0], [1], [0, 0, 1, 1], [], []>} : vector<128x128xbf16>, vector<128x128xbf16>, vector<128x128xf32> -> vector<128x128xf32>
    %c0_3 = arith.constant 0 : index
    %c0_4 = arith.constant 0 : index
    %4 = vector.load %arg3[%c0_3, %c0_4] : memref<1x128xf32, #tpu.memory_space<vmem>>, vector<1x128xf32>
    %5 = vector.broadcast %4 : vector<1x128xf32> to vector<128x128xf32>
    %6 = arith.addf %3, %5 : vector<128x128xf32>
    %c0_5 = arith.constant 0 : index
    %c0_6 = arith.constant 0 : index
    %7 = vector.load %arg4[%c0_5, %c0_6] : memref<1x128xf32, #tpu.memory_space<vmem>>, vector<1x128xf32>
    %c0_7 = arith.constant 0 : index
    %c0_8 = arith.constant 0 : index
    %8 = vector.load %arg5[%c0_7, %c0_8] : memref<1x128xf32, #tpu.memory_space<vmem>>, vector<1x128xf32>
    %9 = tpu.iota {dimensions = array<i32: 1>} : vector<128x128xi32>
    %c8_i32 = arith.constant 8 : i32
    %10 = vector.broadcast %c8_i32 : i32 to vector<128x128xi32>
    %11 = arith.cmpi slt, %9, %10 : vector<128x128xi32>
    %cst_9 = arith.constant 0.000000e+00 : f32
    %12 = vector.broadcast %cst_9 : f32 to vector<128x128xf32>
    %13 = arith.select %11, %6, %12 : vector<128x128xi1>, vector<128x128xf32>
    %cst_10 = arith.constant dense<0.000000e+00> : vector<128xf32>
    %14 = vector.multi_reduction <add>, %13, %cst_10 [1] : vector<128x128xf32> to vector<128xf32>
    %15 = vector.shape_cast %14 : vector<128xf32> to vector<128x1xf32>
    %cst_11 = arith.constant 1.250000e-01 : f32
    %16 = vector.broadcast %cst_11 : f32 to vector<128x1xf32>
    %17 = arith.mulf %15, %16 : vector<128x1xf32>
    %18 = vector.broadcast %17 : vector<128x1xf32> to vector<128x128xf32>
    %19 = arith.subf %6, %18 : vector<128x128xf32>
    %cst_12 = arith.constant 0.000000e+00 : f32
    %20 = vector.broadcast %cst_12 : f32 to vector<128x128xf32>
    %21 = arith.select %11, %19, %20 : vector<128x128xi1>, vector<128x128xf32>
    %22 = arith.mulf %21, %21 : vector<128x128xf32>
    %cst_13 = arith.constant dense<0.000000e+00> : vector<128xf32>
    %23 = vector.multi_reduction <add>, %22, %cst_13 [1] : vector<128x128xf32> to vector<128xf32>
    %24 = vector.shape_cast %23 : vector<128xf32> to vector<128x1xf32>
    %cst_14 = arith.constant 1.250000e-01 : f32
    %25 = vector.broadcast %cst_14 : f32 to vector<128x1xf32>
    %26 = arith.mulf %24, %25 : vector<128x1xf32>
    %cst_15 = arith.constant 9.99999997E-7 : f32
    %27 = vector.broadcast %cst_15 : f32 to vector<128x1xf32>
    %28 = arith.addf %26, %27 : vector<128x1xf32>
    %29 = math.rsqrt %28 : vector<128x1xf32>
    %30 = vector.broadcast %29 : vector<128x1xf32> to vector<128x128xf32>
    %31 = arith.mulf %21, %30 : vector<128x128xf32>
    %32 = vector.broadcast %7 : vector<1x128xf32> to vector<128x128xf32>
    %33 = arith.mulf %31, %32 : vector<128x128xf32>
    %34 = vector.broadcast %8 : vector<1x128xf32> to vector<128x128xf32>
    %35 = arith.addf %33, %34 : vector<128x128xf32>
    %c0_16 = arith.constant 0 : index
    %c0_17 = arith.constant 0 : index
    %36 = vector.load %arg6[%c0_16, %c0_17] : memref<128x128xf32, #tpu.memory_space<vmem>>, vector<128x128xf32>
    tpu.vector_store %arg6[%c0_16, %c0_17], %35 {strides = array<i32>} : memref<128x128xf32, #tpu.memory_space<vmem>>, vector<128x128xf32>,
    return
  }
  func.func @transform_0(%arg0: i32) -> (i32, i32) {
    %c0_i32 = arith.constant 0 : i32
    %c0_i32_0 = arith.constant 0 : i32
    return %arg0, %c0_i32 : i32, i32
  }
  func.func @transform_1(%arg0: i32) -> (i32, i32) {
    %c0_i32 = arith.constant 0 : i32
    %c0_i32_0 = arith.constant 0 : i32
    %c0_i32_1 = arith.constant 0 : i32
    return %c0_i32, %c0_i32_0 : i32, i32
  }
  func.func @transform_2(%arg0: i32) -> (i32, i32) {
    %c0_i32 = arith.constant 0 : i32
    %c0_i32_0 = arith.constant 0 : i32
    %c0_i32_1 = arith.constant 0 : i32
    return %c0_i32, %c0_i32_0 : i32, i32
  }
  func.func @transform_3(%arg0: i32) -> (i32, i32) {
    %c0_i32 = arith.constant 0 : i32
    %c0_i32_0 = arith.constant 0 : i32
    %c0_i32_1 = arith.constant 0 : i32
    return %c0_i32, %c0_i32_0 : i32, i32
  }
  func.func @transform_4(%arg0: i32) -> (i32, i32) {
    %c0_i32 = arith.constant 0 : i32
    %c0_i32_0 = arith.constant 0 : i32
    %c0_i32_1 = arith.constant 0 : i32
    return %c0_i32, %c0_i32_0 : i32, i32
  }
  func.func @transform_5(%arg0: i32) -> (i32, i32) {
    %c0_i32 = arith.constant 0 : i32
    %c0_i32_0 = arith.constant 0 : i32
    return %arg0, %c0_i32 : i32, i32
  }
}

</mosaic_0001>

<bundles_post_ra>
// kernel: tpu_custom_call.1
= control target key start
LH: loop header
LB: loop body
LE: loop exit
PB: predicated region body
PF: predicated region fallthrough
CT: control target
= control target key end

     0   :  { %10 = vsyncpa [#allocation3], 0  ;;  %s1062_s0 = inlined_call_operand.hbm [shape: f32[128,128], index: 0, kind: input, shape index: {}]   ;;  %s1063_s1 = inlined_call_operand.hbm [shape: bf16[128,128], index: 1, kind: input, shape index: {}]   ;;  %s1064_s2 = inlined_call_operand.vmem [shape: f32[1,128], index: 2, kind: input, shape index: {}]   ;;  %s1065_s3 = inlined_call_operand.vmem [shape: f32[1,128], index: 3, kind: input, shape index: {}]   ;;  %s1066_s4 = inlined_call_operand.vmem [shape: f32[1,128], index: 4, kind: input, shape index: {}]   ;;  %s1067_s5 = inlined_call_operand.hbm [shape: f32[128,128], index: 5, kind: output, shape index: {}]  }
   0x1   :  { %11 = vsyncpa [#allocation6], 0 }
   0x2   :  { %12 = vsyncpa [#allocation4], 0  ;;  %s727_s18 = smov [#allocation2]   ;;  %s655_s22 = scalar_lea.hbm %s1062_s0, 2048 }
   0x3   :  { %s18_s19 = sshll.u32 %s727_s18, 4  ;;  %p656_p0 = scmp.ne.s32.totalorder %s1062_s0, %s655_s22  ;;  %s19_s19 = int_to_ptr.vmem [resolvable:$true] %s18_s19 }
   0x4   :  { %p659_p1 = scmp.lt.u32.totalorder %s655_s22, %s1062_s0 }
   0x6   :  { %p661_p2 = pnand %p659_p1, %p656_p0 }
   0x8   :  { %664 = shalt.err (!%p661_p2)
}
   0x9   :  { %s665_s27 = scalar_lea.vmem %s19_s19, 2048  ;;  %p670_p4 = scmp.lt.s32.totalorder %s19_s19, %s19_s19 }
   0xa   :  { %p666_p3 = scmp.ne.s32.totalorder %s19_s19, %s665_s27  ;;  %p671_p5 = scmp.lt.s32.totalorder %s665_s27, %s665_s27 }
   0xc   :  { %p672_p6 = por %p671_p5, %p670_p4 }
   0xe   :  { %p673_p7 = pnand %p672_p6, %p666_p3 }
  0x10   :  { %676 = shalt.err (!%p673_p7)
}
  0x11   :  { %s728_s28 = smov 128   ;;  %s729_s29 = smov 8  }
  0x12   :  { %24 = dma.hbm_to_vmem [thread:$0]  %s1062_s0, 2048, %s19_s19, [#allocation3], %s728_s28, %s728_s28, %s729_s29  }
  0x13   :  { %s730_s7 = smov [#allocation5]   ;;  %s677_s11 = scalar_lea.hbm %s1063_s1, 1024 }
  0x14   :  { %s30_s8 = sshll.u32 %s730_s7, 4  ;;  %p678_p8 = scmp.ne.s32.totalorder %s1063_s1, %s677_s11  ;;  %s31_s8 = int_to_ptr.vmem [resolvable:$true] %s30_s8 }
  0x15   :  { %p681_p9 = scmp.lt.u32.totalorder %s677_s11, %s1063_s1 }
  0x17   :  { %p683_p10 = pnand %p681_p9, %p678_p8 }
  0x19   :  { %686 = shalt.err (!%p683_p10)
}
  0x1a   :  { %s687_s16 = scalar_lea.vmem %s31_s8, 1024  ;;  %p692_p12 = scmp.lt.s32.totalorder %s31_s8, %s31_s8 }
  0x1b   :  { %p688_p11 = scmp.ne.s32.totalorder %s31_s8, %s687_s16  ;;  %p693_p13 = scmp.lt.s32.totalorder %s687_s16, %s687_s16 }
  0x1d   :  { %p694_p0 = por %p693_p13, %p692_p12 }
  0x1f   :  { %p695_p1 = pnand %p694_p0, %p688_p11 }
  0x21   :  { %698 = shalt.err (!%p695_p1)
}
  0x22   :  { %s731_s0 = smov 64   ;;  %s732_s17 = smov 4  }
  0x23   :  { %36 = dma.hbm_to_vmem [thread:$0]  %s1063_s1, 1024, %s31_s8, [#allocation6], %s731_s0, %s731_s0, %s732_s17  }
  0x24   :  { %721 = dma.done.wait [#allocation3], 2048  }
  0x25   :  { %722 = vsyncadd [#allocation3], 4294965248 }
  0x26   :  { %723 = dma.done.wait [#allocation6], 1024  }
  0x27   :  { %724 = vsyncadd [#allocation6], 4294966272  ;;  %v615_v0 = vld [vmem:[#allocation5] sm:$0xff]   ;;  %v616_v1 = vld [vmem:[#allocation5 + $0x8] sm:$0xff]   ;;  %v244_v32 = vlaneseq }
  0x28   :  { %560 = vmatprep.subr.bf16.mxu0 %v615_v0  ;;  %592 = vmatprep.subr.bf16.mxu1 %v615_v0  ;;  %v617_v2 = vld [vmem:[#allocation5 + $0x10] sm:$0xff]   ;;  %v618_v3 = vld [vmem:[#allocation5 + $0x18] sm:$0xff]   ;;  %v50_v4 = vld [vmem:[#allocation2] sm:$0xff] }
  0x29   :  { %561 = vmatpush3.bf16.msra.mxu0 %v615_v0  ;;  %600 = vmatpush3.bf16.msra.mxu1 %v615_v0  ;;  %v51_v5 = vld [vmem:[#allocation2 + $0x8] sm:$0xff]  ;;  %v58_v6 = vld [vmem:[#allocation2 + $0x40] sm:$0xff]  ;;  %v621_v12 = vld [vmem:[#allocation5 + $0x30] sm:$0xff]   ;;  %v791_v33 = vand.u32 127, %v244_v32 }
  0x2a   :  { %562 = vmatprep.subr.bf16.mxu0 %v616_v1  ;;  %593 = vmatprep.subr.bf16.mxu1 %v616_v1  ;;  %v66_v7 = vpack.c.bf16 %v51_v5, %v50_v4  ;;  %v59_v8 = vld [vmem:[#allocation2 + $0x48] sm:$0xff]  ;;  %v619_v10 = vld [vmem:[#allocation5 + $0x20] sm:$0xff]   ;;  %v622_v13 = vld [vmem:[#allocation5 + $0x38] sm:$0xff]  }
  0x2b   :  { %v70_v9 = vpack.c.bf16 %v59_v8, %v58_v6  ;;  %v620_v11 = vld [vmem:[#allocation5 + $0x28] sm:$0xff]   ;;  %v52_v14 = vld [vmem:[#allocation2 + $0x10] sm:$0xff]  ;;  %v53_v15 = vld [vmem:[#allocation2 + $0x18] sm:$0xff]  ;;  %vm246_vm0 = vcmp.lt.s32.totalorder %v791_v33, 8 }
  0x2c   :  { %576 = vmatprep.mubr.bf16.mxu0 %v66_v7  ;;  %v60_v16 = vld [vmem:[#allocation2 + $0x50] sm:$0xff]  ;;  %v61_v17 = vld [vmem:[#allocation2 + $0x58] sm:$0xff]  ;;  %v54_v18 = vld [vmem:[#allocation2 + $0x20] sm:$0xff]  ;;  %v67_v22 = vpack.c.bf16 %v53_v15, %v52_v14 }
  0x2d   :  { %563 = vmatpush3.bf16.msra.mxu0 %v616_v1  ;;  %601 = vmatpush3.bf16.msra.mxu1 %v616_v1  ;;  %v55_v19 = vld [vmem:[#allocation2 + $0x28] sm:$0xff]  ;;  %v62_v20 = vld [vmem:[#allocation2 + $0x60] sm:$0xff]  ;;  %v71_v23 = vpack.c.bf16 %v61_v17, %v60_v16  ;;  %v56_v26 = vld [vmem:[#allocation2 + $0x30] sm:$0xff] }
  0x2e   :  { %564 = vmatprep.subr.bf16.mxu0 %v617_v2  ;;  %594 = vmatprep.subr.bf16.mxu1 %v617_v2  ;;  %v63_v21 = vld [vmem:[#allocation2 + $0x68] sm:$0xff]  ;;  %v68_v24 = vpack.c.bf16 %v55_v19, %v54_v18  ;;  %v57_v27 = vld [vmem:[#allocation2 + $0x38] sm:$0xff]  ;;  %v64_v28 = vld [vmem:[#allocation2 + $0x70] sm:$0xff] }
  0x2f   :  { %584 = vmatprep.mubr.bf16.mxu1 %v70_v9  ;;  %v72_v25 = vpack.c.bf16 %v63_v21, %v62_v20  ;;  %v65_v29 = vld [vmem:[#allocation2 + $0x78] sm:$0xff]  ;;  %v69_v30 = vpack.c.bf16 %v57_v27, %v56_v26  ;;  %v533_v34 = vld [vmem:[%s1064_s2] ss:$0 sm:$0xff] }
  0x30   :  { %v73_v31 = vpack.c.bf16 %v65_v29, %v64_v28 }
  0x31   :  { %565 = vmatpush3.bf16.msra.mxu0 %v617_v2  ;;  %602 = vmatpush3.bf16.msra.mxu1 %v617_v2 }
  0x32   :  { %566 = vmatprep.subr.bf16.mxu0 %v618_v3  ;;  %595 = vmatprep.subr.bf16.mxu1 %v618_v3 }
  0x35   :  { %567 = vmatpush3.bf16.msra.mxu0 %v618_v3  ;;  %603 = vmatpush3.bf16.msra.mxu1 %v618_v3 }
  0x36   :  { %568 = vmatprep.subr.bf16.mxu0 %v619_v10  ;;  %596 = vmatprep.subr.bf16.mxu1 %v619_v10 }
  0x39   :  { %569 = vmatpush3.bf16.msra.mxu0 %v619_v10  ;;  %604 = vmatpush3.bf16.msra.mxu1 %v619_v10 }
  0x3a   :  { %570 = vmatprep.subr.bf16.mxu0 %v620_v11  ;;  %597 = vmatprep.subr.bf16.mxu1 %v620_v11 }
  0x3d   :  { %571 = vmatpush3.bf16.msra.mxu0 %v620_v11  ;;  %605 = vmatpush3.bf16.msra.mxu1 %v620_v11 }
  0x3e   :  { %572 = vmatprep.subr.bf16.mxu0 %v621_v12  ;;  %598 = vmatprep.subr.bf16.mxu1 %v621_v12 }
  0x41   :  { %573 = vmatpush3.bf16.msra.mxu0 %v621_v12  ;;  %606 = vmatpush3.bf16.msra.mxu1 %v621_v12 }
  0x42   :  { %574 = vmatprep.subr.bf16.mxu0 %v622_v13  ;;  %599 = vmatprep.subr.bf16.mxu1 %v622_v13 }
  0x45   :  { %575 = vmatpush3.bf16.msra.mxu0 %v622_v13  ;;  %607 = vmatpush3.bf16.msra.mxu1 %v622_v13 }
  0x48   :  { %577 = vmatmul.mubr.bf16.vlgmr.msra.gmra.mrb[0].mxu0 %v67_v22  ;;  %585 = vmatmul.mubr.bf16.vlgmr.msra.gmra.mrb[0].mxu1 %v71_v23 }
  0x49   :  { %580 = vmatprep.mubr.bf16.mxu0 %v68_v24  ;;  %588 = vmatprep.mubr.bf16.mxu1 %v72_v25 }
  0x50   :  { %581 = vmatmul.mubr.bf16.gmra.mrb[4].mxu0 %v69_v30  ;;  %589 = vmatmul.mubr.bf16.gmra.mrb[4].mxu1 %v73_v31 }
 0x11b   :  { %v578_v35 = vpop.f32.mrb[0].mxu0  ;;  %v586_v36 = vpop.f32.mrb[0].mxu1 }
 0x11c   :  { %v797_v37 = vadd.f32 %v578_v35, %v533_v34  ;;  %v799_v38 = vadd.f32 %v586_v36, %v533_v34  ;;  %v179_v39 = vpop.f32.mrb[1].mxu0  ;;  %v211_v40 = vpop.f32.mrb[1].mxu1 }
 0x11d   :  { %v579_v41 = vpop.f32.mrb[2].mxu0  ;;  %v587_v42 = vpop.f32.mrb[2].mxu1  ;;  %v801_v43 = vadd.f32 %v533_v34, %v179_v39  ;;  %v811_v49 = vadd.f32 %v533_v34, %v211_v40 }
 0x11e   :  { %v803_v44 = vadd.f32 %v579_v41, %v533_v34  ;;  %v182_v45 = vpop.f32.mrb[3].mxu0  ;;  %v214_v46 = vpop.f32.mrb[3].mxu1  ;;  %v257_v47 = vsel %vm246_vm0, %v799_v38, 0.0  ;;  %v249_v48 = vsel %vm246_vm0, %v797_v37, 0.0  ;;  %v813_v50 = vadd.f32 %v587_v42, %v533_v34 }
 0x11f   :  { %283 = vadd.xlane.f32.xlu0 %v257_v47  ;;  %267 = vadd.xlane.f32.xlu1 %v249_v48  ;;  %v247_v52 = vsel %vm246_vm0, %v801_v43, 0.0  ;;  %v821_v59 = vadd.f32 %v533_v34, %v182_v45  ;;  %v823_v60 = vadd.f32 %v533_v34, %v214_v46  ;;  %v255_v62 = vsel %vm246_vm0, %v811_v49, 0.0 }
 0x120   :  { %v250_v51 = vsel %vm246_vm0, %v803_v44, 0.0  ;;  %v258_v61 = vsel %vm246_vm0, %v813_v50, 0.0 }
 0x121   :  { %v256_v3 = vsel %vm246_vm0, %v823_v60, 0.0  ;;  %v248_v4 = vsel %vm246_vm0, %v821_v59, 0.0 }
 0x123   :  { %269 = vadd.xlane.f32.xlu1 %v250_v51  ;;  %263 = vadd.xlane.f32.xlu0 %v247_v52  ;;  %v582_v53 = vpop.f32.mrb[4].mxu0  ;;  %v590_v54 = vpop.f32.mrb[4].mxu1 }
 0x124   :  { %v195_v55 = vpop.f32.mrb[5].mxu0  ;;  %v227_v56 = vpop.f32.mrb[5].mxu1  ;;  %v831_v1 = vadd.f32 %v582_v53, %v533_v34  ;;  %v867_v15 = vadd.f32 %v590_v54, %v533_v34 }
 0x125   :  { %v583_v57 = vpop.f32.mrb[6].mxu0  ;;  %v591_v58 = vpop.f32.mrb[6].mxu1  ;;  %v847_v7 = vadd.f32 %v533_v34, %v195_v55  ;;  %v851_v9 = vadd.f32 %v533_v34, %v227_v56 }
 0x126   :  { %v198_v63 = vpop.f32.mrb[7].mxu0  ;;  %v230_v0 = vpop.f32.mrb[7].mxu1  ;;  %v833_v2 = vadd.f32 %v583_v57, %v533_v34  ;;  %v253_v6 = vsel %vm246_vm0, %v831_v1, 0.0  ;;  %v869_v16 = vadd.f32 %v591_v58, %v533_v34  ;;  %v261_v18 = vsel %vm246_vm0, %v867_v15, 0.0 }
 0x127   :  { %285 = vadd.xlane.f32.xlu1 %v258_v61  ;;  %279 = vadd.xlane.f32.xlu0 %v255_v62  ;;  %v849_v8 = vadd.f32 %v533_v34, %v198_v63  ;;  %v853_v10 = vadd.f32 %v533_v34, %v230_v0  ;;  %v251_v12 = vsel %vm246_vm0, %v847_v7, 0.0  ;;  %v259_v14 = vsel %vm246_vm0, %v851_v9, 0.0 }
 0x128   :  { %v254_v5 = vsel %vm246_vm0, %v833_v2, 0.0  ;;  %v262_v17 = vsel %vm246_vm0, %v869_v16, 0.0 }
 0x129   :  { %v252_v11 = vsel %vm246_vm0, %v849_v8, 0.0  ;;  %v260_v13 = vsel %vm246_vm0, %v853_v10, 0.0 }
 0x12b   :  { %281 = vadd.xlane.f32.xlu1 %v256_v3  ;;  %265 = vadd.xlane.f32.xlu0 %v248_v4 }
 0x12f   :  { %277 = vadd.xlane.f32.xlu1 %v254_v5  ;;  %275 = vadd.xlane.f32.xlu0 %v253_v6 }
 0x133   :  { %273 = vadd.xlane.f32.xlu1 %v252_v11  ;;  %271 = vadd.xlane.f32.xlu0 %v251_v12 }
 0x137   :  { %289 = vadd.xlane.f32.xlu1 %v260_v13  ;;  %287 = vadd.xlane.f32.xlu0 %v259_v14 }
 0x13b   :  { %293 = vadd.xlane.f32.xlu1 %v262_v17  ;;  %291 = vadd.xlane.f32.xlu0 %v261_v18 }
 0x1ac   :  { %v284_v19 = vpop.xlane.xlu0 %283  ;;  %v268_v20 = vpop.xlane.xlu1 %267 }
 0x1ad   :  { %v305_v21 = vmul.f32 0.125, %v284_v19  ;;  %v297_v22 = vmul.f32 0.125, %v268_v20 }
 0x1af   :  { %v321_v23 = vsub.f32 %v799_v38, %v305_v21  ;;  %v313_v24 = vsub.f32 %v797_v37, %v297_v22 }
 0x1b0   :  { %v270_v25 = vpop.xlane.xlu1 %269  ;;  %v264_v26 = vpop.xlane.xlu0 %263 }
 0x1b1   :  { %v298_v27 = vmul.f32 0.125, %v270_v25  ;;  %v295_v28 = vmul.f32 0.125, %v264_v26  ;;  %v881_v29 = vsel %vm246_vm0, %v313_v24, 0.0  ;;  %v889_v34 = vsel %vm246_vm0, %v321_v23, 0.0 }
 0x1b2   :  { %v345_v30 = vmul.f32 %v881_v29, %v881_v29  ;;  %v353_v41 = vmul.f32 %v889_v34, %v889_v34 }
 0x1b3   :  { %v314_v31 = vsub.f32 %v803_v44, %v298_v27  ;;  %v311_v32 = vsub.f32 %v801_v43, %v295_v28 }
 0x1b4   :  { %v286_v35 = vpop.xlane.xlu1 %285  ;;  %363 = vadd.xlane.f32.xlu0 %v345_v30  ;;  %v280_v36 = vpop.xlane.xlu0 %279 }
 0x1b5   :  { %v306_v37 = vmul.f32 0.125, %v286_v35  ;;  %v303_v38 = vmul.f32 0.125, %v280_v36  ;;  %v893_v39 = vsel %vm246_vm0, %v314_v31, 0.0  ;;  %v903_v44 = vsel %vm246_vm0, %v311_v32, 0.0 }
 0x1b6   :  { %v346_v40 = vmul.f32 %v893_v39, %v893_v39 }
 0x1b7   :  { %v322_v42 = vsub.f32 %v813_v50, %v306_v37  ;;  %v319_v43 = vsub.f32 %v811_v49, %v303_v38  ;;  %v343_v49 = vmul.f32 %v903_v44, %v903_v44 }
 0x1b8   :  { %v282_v45 = vpop.xlane.xlu1 %281  ;;  %365 = vadd.xlane.f32.xlu1 %v346_v40  ;;  %379 = vadd.xlane.f32.xlu0 %v353_v41  ;;  %v266_v46 = vpop.xlane.xlu0 %265 }
 0x1b9   :  { %v304_v47 = vmul.f32 0.125, %v282_v45  ;;  %v296_v48 = vmul.f32 0.125, %v266_v46  ;;  %v907_v51 = vsel %vm246_vm0, %v322_v42, 0.0  ;;  %v917_v54 = vsel %vm246_vm0, %v319_v43, 0.0 }
 0x1ba   :  { %v354_v52 = vmul.f32 %v907_v51, %v907_v51  ;;  %v351_v62 = vmul.f32 %v917_v54, %v917_v54 }
 0x1bb   :  { %v320_v50 = vsub.f32 %v823_v60, %v304_v47  ;;  %v312_v53 = vsub.f32 %v821_v59, %v296_v48 }
 0x1bc   :  { %v278_v55 = vpop.xlane.xlu1 %277  ;;  %381 = vadd.xlane.f32.xlu1 %v354_v52  ;;  %359 = vadd.xlane.f32.xlu0 %v343_v49  ;;  %v276_v56 = vpop.xlane.xlu0 %275 }
 0x1bd   :  { %v302_v57 = vmul.f32 0.125, %v278_v55  ;;  %v301_v58 = vmul.f32 0.125, %v276_v56  ;;  %v921_v61 = vsel %vm246_vm0, %v312_v53, 0.0  ;;  %v931_v0 = vsel %vm246_vm0, %v320_v50, 0.0 }
 0x1be   :  { %v344_v59 = vmul.f32 %v921_v61, %v921_v61  ;;  %v352_v12 = vmul.f32 %v931_v0, %v931_v0 }
 0x1bf   :  { %v318_v60 = vsub.f32 %v833_v2, %v302_v57  ;;  %v317_v63 = vsub.f32 %v831_v1, %v301_v58 }
 0x1c0   :  { %v274_v3 = vpop.xlane.xlu1 %273  ;;  %375 = vadd.xlane.f32.xlu0 %v351_v62  ;;  %361 = vadd.xlane.f32.xlu1 %v344_v59  ;;  %v272_v4 = vpop.xlane.xlu0 %271 }
 0x1c1   :  { %v300_v5 = vmul.f32 0.125, %v274_v3  ;;  %v299_v6 = vmul.f32 0.125, %v272_v4  ;;  %v935_v11 = vsel %vm246_vm0, %v317_v63, 0.0  ;;  %v945_v14 = vsel %vm246_vm0, %v318_v60, 0.0  ;;  %v992_v63 = vld [vmem:[%s1065_s3] ss:$0 sm:$0xff] }
 0x1c2   :  { %v349_v1 = vmul.f32 %v935_v11, %v935_v11  ;;  %v350_v22 = vmul.f32 %v945_v14, %v945_v14  ;;  %s733_s3 = smov [#allocation7]  }
 0x1c3   :  { %v316_v2 = vsub.f32 %v849_v8, %v300_v5  ;;  %v315_v13 = vsub.f32 %v847_v7, %v299_v6 }
 0x1c4   :  { %v290_v17 = vpop.xlane.xlu1 %289  ;;  %377 = vadd.xlane.f32.xlu1 %v352_v12  ;;  %371 = vadd.xlane.f32.xlu0 %v349_v1  ;;  %v288_v18 = vpop.xlane.xlu0 %287  ;;  %v998_v1 = vld [vmem:[%s1066_s4] ss:$0 sm:$0xff]  ;;  %s520_s4 = sshll.u32 %s733_s3, 4  ;;  %s521_s4 = int_to_ptr.vmem [resolvable:$true] %s520_s4 }
 0x1c5   :  { %v308_v19 = vmul.f32 0.125, %v290_v17  ;;  %v307_v20 = vmul.f32 0.125, %v288_v18  ;;  %v949_v21 = vsel %vm246_vm0, %v315_v13, 0.0  ;;  %v959_v24 = vsel %vm246_vm0, %v316_v2, 0.0  ;;  %s699_s24 = scalar_lea.vmem %s521_s4, 2048  ;;  %p704_p3 = scmp.lt.s32.totalorder %s521_s4, %s521_s4 }
 0x1c6   :  { %v347_v7 = vmul.f32 %v949_v21, %v949_v21  ;;  %v348_v31 = vmul.f32 %v959_v24, %v959_v24  ;;  %p700_p2 = scmp.ne.s32.totalorder %s521_s4, %s699_s24  ;;  %p705_p4 = scmp.lt.s32.totalorder %s699_s24, %s699_s24 }
 0x1c7   :  { %v324_v8 = vsub.f32 %v853_v10, %v308_v19  ;;  %v323_v23 = vsub.f32 %v851_v9, %v307_v20 }
 0x1c8   :  { %v294_v25 = vpop.xlane.xlu1 %293  ;;  %373 = vadd.xlane.f32.xlu1 %v350_v22  ;;  %367 = vadd.xlane.f32.xlu0 %v347_v7  ;;  %v292_v26 = vpop.xlane.xlu0 %291  ;;  %p706_p5 = por %p705_p4, %p704_p3 }
 0x1c9   :  { %v310_v27 = vmul.f32 0.125, %v294_v25  ;;  %v309_v28 = vmul.f32 0.125, %v292_v26  ;;  %v963_v30 = vsel %vm246_vm0, %v323_v23, 0.0  ;;  %v973_v35 = vsel %vm246_vm0, %v324_v8, 0.0 }
 0x1ca   :  { %v355_v9 = vmul.f32 %v963_v30, %v963_v30  ;;  %v356_v37 = vmul.f32 %v973_v35, %v973_v35  ;;  %p707_p6 = pnand %p706_p5, %p700_p2 }
 0x1cb   :  { %v326_v10 = vsub.f32 %v869_v16, %v310_v27  ;;  %v325_v32 = vsub.f32 %v867_v15, %v309_v28 }
 0x1cc   :  { %369 = vadd.xlane.f32.xlu1 %v348_v31  ;;  %383 = vadd.xlane.f32.xlu0 %v355_v9 }
 0x1cd   :  { %v977_v36 = vsel %vm246_vm0, %v325_v32, 0.0  ;;  %v985_v16 = vsel %vm246_vm0, %v326_v10, 0.0 }
 0x1ce   :  { %v357_v38 = vmul.f32 %v977_v36, %v977_v36  ;;  %v358_v15 = vmul.f32 %v985_v16, %v985_v16 }
 0x1d0   :  { %385 = vadd.xlane.f32.xlu1 %v356_v37  ;;  %387 = vadd.xlane.f32.xlu0 %v357_v38 }
 0x1d4   :  { %389 = vadd.xlane.f32.xlu1 %v358_v15 }
 0x241   :  { %v364_v40 = vpop.xlane.xlu0 %363 }
 0x242   :  { %v393_v41 = vmul.f32 0.125, %v364_v40 }
 0x244   :  { %v409_v42 = vadd.f32 1e-06, %v393_v41 }
 0x245   :  { %v366_v43 = vpop.xlane.xlu1 %365  ;;  %v380_v45 = vpop.xlane.xlu0 %379 }
 0x246   :  { %623 = vrsqrt.f32 %v409_v42  ;;  %v394_v46 = vmul.f32 0.125, %v366_v43  ;;  %v401_v47 = vmul.f32 0.125, %v380_v45 }
 0x248   :  { %v410_v48 = vadd.f32 1e-06, %v394_v46  ;;  %v417_v52 = vadd.f32 1e-06, %v401_v47 }
 0x249   :  { %v382_v49 = vpop.xlane.xlu1 %381  ;;  %v360_v33 = vpop.xlane.xlu0 %359 }
 0x24a   :  { %625 = vrsqrt.f32 %v410_v48  ;;  %v402_v50 = vmul.f32 0.125, %v382_v49  ;;  %v391_v53 = vmul.f32 0.125, %v360_v33 }
 0x24b   :  { %627 = vrsqrt.f32 %v417_v52 }
 0x24c   :  { %v418_v55 = vadd.f32 1e-06, %v402_v50  ;;  %v407_v56 = vadd.f32 1e-06, %v391_v53 }
 0x24d   :  { %v362_v57 = vpop.xlane.xlu1 %361  ;;  %v376_v58 = vpop.xlane.xlu0 %375 }
 0x24e   :  { %629 = vrsqrt.f32 %v418_v55  ;;  %v392_v62 = vmul.f32 0.125, %v362_v57  ;;  %v399_v59 = vmul.f32 0.125, %v376_v58 }
 0x24f   :  { %631 = vrsqrt.f32 %v407_v56 }
 0x250   :  { %v624_v60 = vpop.eup %623  ;;  %v408_v3 = vadd.f32 1e-06, %v392_v62  ;;  %v415_v4 = vadd.f32 1e-06, %v399_v59 }
 0x251   :  { %v441_v5 = vmul.f32 %v624_v60, %v881_v29  ;;  %v378_v6 = vpop.xlane.xlu1 %377  ;;  %v372_v12 = vpop.xlane.xlu0 %371 }
 0x252   :  { %633 = vrsqrt.f32 %v408_v3  ;;  %v400_v2 = vmul.f32 0.125, %v378_v6  ;;  %v397_v13 = vmul.f32 0.125, %v372_v12 }
 0x253   :  { %v463_v17 = vmul.f32 %v992_v63, %v441_v5  ;;  %635 = vrsqrt.f32 %v415_v4 }
 0x254   :  { %v626_v18 = vpop.eup %625  ;;  %v416_v19 = vadd.f32 1e-06, %v400_v2  ;;  %v413_v20 = vadd.f32 1e-06, %v397_v13 }
 0x255   :  { %v628_v22 = vpop.eup %627  ;;  %v485_v7 = vadd.f32 %v998_v1, %v463_v17  ;;  %v442_v29 = vmul.f32 %v626_v18, %v893_v39  ;;  %v374_v8 = vpop.xlane.xlu1 %373 }
 0x256   :  { %v368_v23 = vpop.xlane.xlu0 %367  ;;  %v449_v25 = vmul.f32 %v628_v22, %v889_v34  ;;  %637 = vrsqrt.f32 %v416_v19  ;;  %v398_v26 = vmul.f32 0.125, %v374_v8 }
 0x257   :  { %v395_v27 = vmul.f32 0.125, %v368_v23  ;;  %501 = vst [vmem:[#allocation7 + $0x10] sm:$0xff] %v485_v7  ;;  %v464_v28 = vmul.f32 %v992_v63, %v442_v29  ;;  %639 = vrsqrt.f32 %v413_v20 }
 0x258   :  { %v630_v31 = vpop.eup %629  ;;  %v471_v9 = vmul.f32 %v992_v63, %v449_v25  ;;  %v414_v10 = vadd.f32 1e-06, %v398_v26 }
 0x259   :  { %v411_v32 = vadd.f32 1e-06, %v395_v27  ;;  %v632_v37 = vpop.eup %631  ;;  %v486_v38 = vadd.f32 %v998_v1, %v464_v28  ;;  %v450_v39 = vmul.f32 %v630_v31, %v907_v51  ;;  %v370_v15 = vpop.xlane.xlu1 %369 }
 0x25a   :  { %v384_v40 = vpop.xlane.xlu0 %383  ;;  %v493_v34 = vadd.f32 %v998_v1, %v471_v9  ;;  %v439_v41 = vmul.f32 %v632_v37, %v903_v44  ;;  %641 = vrsqrt.f32 %v414_v10  ;;  %v396_v42 = vmul.f32 0.125, %v370_v15 }
 0x25b   :  { %502 = vst [vmem:[#allocation7 + $0x18] sm:$0xff] %v486_v38  ;;  %v472_v43 = vmul.f32 %v992_v63, %v450_v39  ;;  %643 = vrsqrt.f32 %v411_v32  ;;  %v403_v45 = vmul.f32 0.125, %v384_v40 }
 0x25c   :  { %v634_v46 = vpop.eup %633  ;;  %509 = vst [vmem:[#allocation7 + $0x50] sm:$0xff] %v493_v34  ;;  %v461_v47 = vmul.f32 %v992_v63, %v439_v41  ;;  %v412_v48 = vadd.f32 1e-06, %v396_v42 }
 0x25d   :  { %v636_v52 = vpop.eup %635  ;;  %v494_v51 = vadd.f32 %v998_v1, %v472_v43  ;;  %v440_v49 = vmul.f32 %v634_v46, %v921_v61  ;;  %v419_v33 = vadd.f32 1e-06, %v403_v45  ;;  %v386_v50 = vpop.xlane.xlu1 %385 }
 0x25e   :  { %v388_v44 = vpop.xlane.xlu0 %387  ;;  %v483_v53 = vadd.f32 %v998_v1, %v461_v47  ;;  %v447_v55 = vmul.f32 %v636_v52, %v917_v54  ;;  %645 = vrsqrt.f32 %v412_v48  ;;  %v404_v56 = vmul.f32 0.125, %v386_v50 }
 0x25f   :  { %510 = vst [vmem:[#allocation7 + $0x58] sm:$0xff] %v494_v51  ;;  %v462_v57 = vmul.f32 %v992_v63, %v440_v49  ;;  %647 = vrsqrt.f32 %v419_v33  ;;  %v405_v58 = vmul.f32 0.125, %v388_v44 }
 0x260   :  { %v638_v62 = vpop.eup %637  ;;  %499 = vst [vmem:[#allocation7] sm:$0xff] %v483_v53  ;;  %v469_v59 = vmul.f32 %v992_v63, %v447_v55  ;;  %v420_v60 = vadd.f32 1e-06, %v404_v56 }
 0x261   :  { %v640_v61 = vpop.eup %639  ;;  %v484_v3 = vadd.f32 %v998_v1, %v462_v57  ;;  %v448_v4 = vmul.f32 %v638_v62, %v931_v0  ;;  %v421_v5 = vadd.f32 1e-06, %v405_v58  ;;  %v390_v6 = vpop.xlane.xlu1 %389 }
 0x262   :  { %v491_v54 = vadd.f32 %v998_v1, %v469_v59  ;;  %v445_v12 = vmul.f32 %v640_v61, %v935_v11  ;;  %649 = vrsqrt.f32 %v420_v60  ;;  %v406_v2 = vmul.f32 0.125, %v390_v6 }
 0x263   :  { %500 = vst [vmem:[#allocation7 + $0x8] sm:$0xff] %v484_v3  ;;  %v470_v13 = vmul.f32 %v992_v63, %v448_v4  ;;  %651 = vrsqrt.f32 %v421_v5 }
 0x264   :  { %v642_v17 = vpop.eup %641  ;;  %507 = vst [vmem:[#allocation7 + $0x40] sm:$0xff] %v491_v54  ;;  %v467_v18 = vmul.f32 %v992_v63, %v445_v12  ;;  %v422_v19 = vadd.f32 1e-06, %v406_v2 }
 0x265   :  { %v644_v20 = vpop.eup %643  ;;  %v492_v0 = vadd.f32 %v998_v1, %v470_v13  ;;  %v446_v22 = vmul.f32 %v642_v17, %v945_v14 }
 0x266   :  { %v489_v7 = vadd.f32 %v998_v1, %v467_v18  ;;  %v443_v11 = vmul.f32 %v644_v20, %v949_v21  ;;  %653 = vrsqrt.f32 %v422_v19 }
 0x267   :  { %508 = vst [vmem:[#allocation7 + $0x48] sm:$0xff] %v492_v0  ;;  %v468_v29 = vmul.f32 %v992_v63, %v446_v22 }
 0x268   :  { %v646_v8 = vpop.eup %645  ;;  %505 = vst [vmem:[#allocation7 + $0x30] sm:$0xff] %v489_v7  ;;  %v465_v23 = vmul.f32 %v992_v63, %v443_v11 }
 0x269   :  { %v648_v25 = vpop.eup %647  ;;  %v490_v26 = vadd.f32 %v998_v1, %v468_v29  ;;  %v444_v27 = vmul.f32 %v646_v8, %v959_v24 }
 0x26a   :  { %v487_v28 = vadd.f32 %v998_v1, %v465_v23  ;;  %v451_v14 = vmul.f32 %v648_v25, %v963_v30 }
 0x26b   :  { %506 = vst [vmem:[#allocation7 + $0x38] sm:$0xff] %v490_v26  ;;  %v466_v21 = vmul.f32 %v992_v63, %v444_v27 }
 0x26c   :  { %v650_v31 = vpop.eup %649  ;;  %503 = vst [vmem:[#allocation7 + $0x20] sm:$0xff] %v487_v28  ;;  %v473_v9 = vmul.f32 %v992_v63, %v451_v14 }
 0x26d   :  { %v652_v10 = vpop.eup %651  ;;  %v488_v32 = vadd.f32 %v998_v1, %v466_v21  ;;  %v452_v37 = vmul.f32 %v650_v31, %v973_v35 }
 0x26e   :  { %v495_v38 = vadd.f32 %v998_v1, %v473_v9  ;;  %v453_v24 = vmul.f32 %v652_v10, %v977_v36 }
 0x26f   :  { %504 = vst [vmem:[#allocation7 + $0x28] sm:$0xff] %v488_v32  ;;  %v474_v39 = vmul.f32 %v992_v63, %v452_v37 }
 0x270   :  { %v654_v30 = vpop.eup %653  ;;  %511 = vst [vmem:[#allocation7 + $0x60] sm:$0xff] %v495_v38  ;;  %v475_v15 = vmul.f32 %v992_v63, %v453_v24 }
 0x271   :  { %v496_v40 = vadd.f32 %v998_v1, %v474_v39  ;;  %v454_v34 = vmul.f32 %v654_v30, %v985_v16 }
 0x272   :  { %v497_v41 = vadd.f32 %v998_v1, %v475_v15 }
 0x273   :  { %512 = vst [vmem:[#allocation7 + $0x68] sm:$0xff] %v496_v40  ;;  %v476_v35 = vmul.f32 %v992_v63, %v454_v34 }
 0x274   :  { %513 = vst [vmem:[#allocation7 + $0x70] sm:$0xff] %v497_v41 }
 0x275   :  { %v498_v36 = vadd.f32 %v998_v1, %v476_v35 }
 0x277   :  { %514 = vst [vmem:[#allocation7 + $0x78] sm:$0xff] %v498_v36 }
 0x278   :  { %710 = shalt.err (!%p707_p6)
}
 0x279   :  { %s711_s27 = scalar_lea.hbm %s1067_s5, 2048 }
 0x27a   :  { %p712_p7 = scmp.ne.s32.totalorder %s1067_s5, %s711_s27  ;;  %p715_p8 = scmp.lt.u32.totalorder %s711_s27, %s1067_s5 }
 0x27c   :  { %p717_p9 = pnand %p715_p8, %p712_p7 }
 0x27e   :  { %720 = shalt.err (!%p717_p9)
}
 0x27f   :  { %526 = dma.vmem_to_hbm [thread:$0]  %s521_s4, 2048, %s1067_s5, [#allocation4], %s728_s28, %s728_s28, %s729_s29  }
 0x280   :  { %725 = dma.done.wait [#allocation4], 2048  }
 0x281   :  { %726 = vsyncadd [#allocation4], 4294965248 }
 0x282   :  { %530 = vsyncpa [#allocation3], 1 }
 0x283   :  { %531 = vsyncpa [#allocation6], 1 }
 0x284   :  { %532 = vsyncpa [#allocation4], 1 }

</bundles_post_ra>
